<compile_context>
chip_gen: v7x
topology: tpu7x:2x2x1
jax: 0.10.0
libtpu: 0.0.40
codegen_flags: <defaults>
</compile_context>

<pallas_src>
import functools

import jax
import jax.numpy as jnp
from jax.experimental import pallas as pl
from jax.experimental.pallas import tpu as pltpu

LANE = 128   # lane tile width; each encoder owns one lane tile of the slab
SUB = 8      # sublane tile height


def _round_up(x, m):
  return (x + m - 1) // m * m


def _smile_mi_kernel(v1_ref, x0i_ref, slab_ref, out_ref, *, feat, w_start, clip):
  """One MI estimate: v1 [N,F], x0i [N,1], slab [R,256] -> out [SUB,LANE]."""
  n = v1_ref.shape[0]

  # ---- unpack the single parameter slab (static, tile-aligned slices) ------
  r_small = w_start + 2 * LANE
  vw0 = slab_ref[0:feat, :]                       # [F, 256]; cols 0:Hv = vw0
  w_bd = slab_ref[w_start:r_small, :]             # [256,256] blockdiag(vw1,aw1)
  bias0 = slab_ref[r_small:r_small + 1, :]        # [1,256] = [vb0 | ab0]
  aw0 = slab_ref[r_small + 1:r_small + 2, :]      # [1,256] atom L0 weight
  bias1 = slab_ref[r_small + 2:r_small + 3, :]    # [1,256] = [vb1 | ab1]

  # ---- fused first layers of BOTH encoders into one [N,256] activation -----
  # left lane tile  (cols   0:128): v_encoder path; cols Hv:128 are exactly 0
  # right lane tile (cols 128:256): atom path;      cols 128+Hxi: are exactly 0
  h = jnp.dot(v1_ref[...], vw0, preferred_element_type=jnp.float32)
  h = jnp.maximum(h + x0i_ref[...] * aw0 + bias0, 0.0)              # [N, 256]

  # ---- fused block-diagonal second layers (one MXU round trip) -------------
  enc = jnp.dot(h, w_bd, preferred_element_type=jnp.float32) + bias1  # [N,256]
  v_enc = enc[:, 0:LANE]           # [N,128]; cols C:128 are zero
  a_enc = enc[:, LANE:2 * LANE]    # [N,128]; cols C:128 are zero

  # ---- critic scores = v_enc @ a_enc.T (transpose folded into the MXU) -----
  scores = jax.lax.dot_general(
      v_enc, a_enc, dimension_numbers=(((1,), (1,)), ((), ())),
      preferred_element_type=jnp.float32)                            # [N, N]

  rows = jax.lax.broadcasted_iota(jnp.int32, (n, n), 0)
  cols = jax.lax.broadcasted_iota(jnp.int32, (n, n), 1)
  eye = rows == cols

  # E_p[f]: mean of the (unclipped) diagonal.
  diag_mean = jnp.sum(jnp.where(eye, scores, 0.0)) / jnp.float32(n)

  # Off-diagonal log-mean-exp of the clipped scores.  Static shift m = clip
  # (clipped values lie in [-clip, clip], so exp args are in [-2*clip, 0]).
  # The diagonal is zeroed in the exp domain: no near-equal subtraction, no
  # -inf sentinels (review correctness fix).
  e = jnp.exp(jnp.clip(scores, -clip, clip) - clip)
  exp_sum_off = jnp.sum(jnp.where(eye, 0.0, e))
  lse_off = clip + jnp.log(exp_sum_off)
  mi = diag_mean - (lse_off - jnp.log(jnp.float32(n * (n - 1))))

  # Lane-dense full-tile store (unmasked vst); wrapper reads element [0, 0].
  out_ref[...] = jnp.full(out_ref.shape, mi, dtype=jnp.float32)


def pack_params(params):
  """Packs the 8 parameter tensors into ONE tile-aligned [R, 256] f32 slab.

  Slab layout (all section starts 8-row aligned, width = 2*LANE = 256 lanes):
    rows [0, F)                       vw0 in cols [0, Hv)
    rows [w_start, w_start + 256)     block-diagonal second layer:
                                        [0:Hv)        x [0:C)        = vw1
                                        [128:128+Hxi) x [128:128+C)  = aw1
    row  w_start + 256                bias0 = [vb0 | ab0]
    row  w_start + 257                aw0   (atom L0 weight, right half)
    row  w_start + 258                bias1 = [vb1 | ab1]
  """
  (vw0, vb0, vw1, vb1, aw0, ab0, aw1, ab1) = params
  f, hv = vw0.shape
  hxi = aw0.shape[1]
  c = vw1.shape[1]
  if max(hv, hxi, c) > LANE:
    raise ValueError("hidden / critic sizes > 128 need a wider slab layout.")

  w_start = _round_up(f, SUB)
  rows = w_start + 2 * LANE + SUB
  slab = jnp.zeros((rows, 2 * LANE), jnp.float32)
  slab = slab.at[0:f, 0:hv].set(jnp.asarray(vw0, jnp.float32))
  slab = slab.at[w_start:w_start + hv, 0:c].set(jnp.asarray(vw1, jnp.float32))
  slab = slab.at[w_start + LANE:w_start + LANE + hxi,
                 LANE:LANE + c].set(jnp.asarray(aw1, jnp.float32))
  r = w_start + 2 * LANE
  slab = slab.at[r, 0:hv].set(jnp.asarray(vb0, jnp.float32).reshape(-1))
  slab = slab.at[r, LANE:LANE + hxi].set(jnp.asarray(ab0, jnp.float32).reshape(-1))
  slab = slab.at[r + 1, LANE:LANE + hxi].set(jnp.asarray(aw0, jnp.float32).reshape(-1))
  slab = slab.at[r + 2, 0:c].set(jnp.asarray(vb1, jnp.float32).reshape(-1))
  slab = slab.at[r + 2, LANE:LANE + c].set(jnp.asarray(ab1, jnp.float32).reshape(-1))
  meta = dict(feat=f, hidden_v=hv, hidden_xi=hxi, c_out=c, w_start=w_start)
  return slab, meta


def downward_smile_mi_batched(v1, x0i, packed_params, clip):
  """Runs B independent estimates in one pallas_call.

  v1 [B, N, F], x0i [B, N, 1] -> [B] scalar MI estimates.
  """
  slab, meta = packed_params
  b, n, f = v1.shape
  if n < 2:
    raise ValueError("DownwardSmileMIEstimator requires >= 2 samples per estimate.")
  if f != meta["feat"]:
    raise ValueError("feature_size mismatch with packed parameters.")

  kernel = functools.partial(_smile_mi_kernel, feat=meta["feat"],
                             w_start=meta["w_start"], clip=float(clip))
  hv, hxi, c = meta["hidden_v"], meta["hidden_xi"], meta["c_out"]
  cost = pl.CostEstimate(
      flops=2 * b * n * (f * hv + (hv + hxi) * c + n * c),
      transcendentals=b * (n * n + 2),
      bytes_accessed=4 * (v1.size + x0i.size + slab.size + b * SUB * LANE))

  out = pl.pallas_call(
      kernel,
      out_shape=jax.ShapeDtypeStruct((b, SUB, LANE), jnp.float32),
      grid=(b,),
      in_specs=[
          pl.BlockSpec((None, n, f), lambda i: (i, 0, 0)),
          pl.BlockSpec((None, n, 1), lambda i: (i, 0, 0)),
          pl.BlockSpec(slab.shape, lambda i: (0, 0)),   # resident across steps
      ],
      out_specs=pl.BlockSpec((None, SUB, LANE), lambda i: (i, 0, 0)),
      compiler_params=pltpu.CompilerParams(dimension_semantics=("parallel",)),
      cost_estimate=cost,
  )(v1, x0i, slab)
  return out[:, 0, 0]


def downward_smile_mi(v1, x0i, packed_params, clip):
  """Single estimate (matches the PyTorch module's forward signature)."""
  return downward_smile_mi_batched(v1[None], x0i[None], packed_params, clip)[0]


def init_params(key, feature_size, hidden_v, hidden_xi, critic_output_size):
  """Deterministic parameter init. Weights stored [in, out]; biases [1, out]."""
  ks = jax.random.split(key, 8)
  s = 0.1
  vw0 = s * jax.random.normal(ks[0], (feature_size, hidden_v), jnp.float32)
  vb0 = s * jax.random.normal(ks[1], (1, hidden_v), jnp.float32)
  vw1 = s * jax.random.normal(ks[2], (hidden_v, critic_output_size), jnp.float32)
  vb1 = s * jax.random.normal(ks[3], (1, critic_output_size), jnp.float32)
  aw0 = s * jax.random.normal(ks[4], (1, hidden_xi), jnp.float32)
  ab0 = s * jax.random.normal(ks[5], (1, hidden_xi), jnp.float32)
  aw1 = s * jax.random.normal(ks[6], (hidden_xi, critic_output_size), jnp.float32)
  ab1 = s * jax.random.normal(ks[7], (1, critic_output_size), jnp.float32)
  return (vw0, vb0, vw1, vb1, aw0, ab0, aw1, ab1)


def reference_mi(v1, x0i, params, clip):
  """Plain-JAX reference of the same forward pass (full f32 matmul precision)."""
  (vw0, vb0, vw1, vb1, aw0, ab0, aw1, ab1) = params
  hp = jax.lax.Precision.HIGHEST
  v_enc = jnp.maximum(jnp.dot(v1, vw0, precision=hp) + vb0, 0.0)
  v_enc = jnp.dot(v_enc, vw1, precision=hp) + vb1
  a_enc = jnp.maximum(jnp.dot(x0i, aw0, precision=hp) + ab0, 0.0)
  a_enc = jnp.dot(a_enc, aw1, precision=hp) + ab1
  scores = jnp.dot(v_enc, a_enc.T, precision=hp)
  n = scores.shape[0]
  diag_mean = jnp.mean(jnp.diag(scores))
  clipped = jnp.clip(scores, -clip, clip)
  off = jnp.where(jnp.eye(n, dtype=bool), -jnp.inf, clipped)
  lse = jax.scipy.special.logsumexp(off)
  return diag_mean - (lse - jnp.log(float(n * (n - 1))))


if __name__ == "__main__":
  # Shapes consistent with the module's forward:
  #   v1  : [n_samples, feature_size]   x0i : [n_samples, 1]
  # plus an estimator-batch axis B that maps onto the parallel grid.
  b_est = 4              # independent estimates per pallas_call (grid axis)
  n = 8                  # samples per estimate
  feature_size = 16
  hidden_v = 32          # hidden_sizes_v_critic  = [32]
  hidden_xi = 32         # hidden_sizes_xi_critic = [32]
  critic_output_size = 8
  clip = 5.0

  key = jax.random.PRNGKey(0)
  k_v, k_x, k_p = jax.random.split(key, 3)
  v1_b = jax.random.normal(k_v, (b_est, n, feature_size), jnp.float32)
  x0i_b = jax.random.normal(k_x, (b_est, n, 1), jnp.float32)
  params = init_params(k_p, feature_size, hidden_v, hidden_xi, critic_output_size)
  packed = pack_params(params)

  # Batched estimates (grid=(B,), parallel axis).
  mi_b = jax.block_until_ready(downward_smile_mi_batched(v1_b, x0i_b, packed, clip))
  for i in range(b_est):
    ref = reference_mi(v1_b[i], x0i_b[i], params, clip)
    assert jnp.allclose(mi_b[i], ref, rtol=1e-4, atol=1e-4), (i, mi_b[i], ref)

  # Robustness check per review: large clip + correlated v1 / x0i (stresses the
  # off-diagonal masking path), via the single-estimate wrapper.
  clip_hi = 25.0
  v1_c = v1_b[0]
  x0i_c = 2.0 * v1_c[:, 0:1] + 0.1 * x0i_b[0]
  mi_c = jax.block_until_ready(downward_smile_mi(v1_c, x0i_c, packed, clip_hi))
  ref_c = reference_mi(v1_c, x0i_c, params, clip_hi)
  assert jnp.allclose(mi_c, ref_c, rtol=1e-4, atol=1e-4), (mi_c, ref_c)

  print("KERNEL_OK")
</pallas_src>

<mosaic_0001>
module attributes {stable_mosaic.version = 11 : i64} {
  func.func @_smile_mi_kernel(%arg0: i32, %arg1: memref<1x8x16xf32, #tpu.memory_space<vmem>>, %arg2: memref<1x8x1xf32, #tpu.memory_space<vmem>>, %arg3: memref<280x256xf32, #tpu.memory_space<vmem>>, %arg4: memref<1x8x128xf32, #tpu.memory_space<vmem>>) attributes {dimension_semantics = [#tpu.dimension_semantics<parallel>], iteration_bounds = array<i64: 4>, scalar_prefetch = 0 : i64, scratch_operands = 0 : i64, tpu.core_type = #tpu.core_type<tc>, window_params = [{transform_indices = @transform_0, window_bounds = array<i64: 1, 8, 16>}, {transform_indices = @transform_1, window_bounds = array<i64: 1, 8, 1>}, {pipeline_mode = #tpu.pipeline_mode<synchronous>, transform_indices = @transform_2, window_bounds = array<i64: 280, 256>}, {transform_indices = @transform_3, window_bounds = array<i64: 1, 8, 128>}]} {
    %c0 = arith.constant 0 : index
    %c0_0 = arith.constant 0 : index
    %0 = vector.load %arg3[%c0, %c0_0] : memref<280x256xf32, #tpu.memory_space<vmem>>, vector<16x256xf32>
    %c16 = arith.constant 16 : index
    %c0_1 = arith.constant 0 : index
    %1 = vector.load %arg3[%c16, %c0_1] : memref<280x256xf32, #tpu.memory_space<vmem>>, vector<256x256xf32>
    %c272 = arith.constant 272 : index
    %c0_2 = arith.constant 0 : index
    %2 = vector.load %arg3[%c272, %c0_2] : memref<280x256xf32, #tpu.memory_space<vmem>>, vector<1x256xf32>
    %c273 = arith.constant 273 : index
    %c0_3 = arith.constant 0 : index
    %3 = vector.load %arg3[%c273, %c0_3] : memref<280x256xf32, #tpu.memory_space<vmem>>, vector<1x256xf32>
    %c274 = arith.constant 274 : index
    %c0_4 = arith.constant 0 : index
    %4 = vector.load %arg3[%c274, %c0_4] : memref<280x256xf32, #tpu.memory_space<vmem>>, vector<1x256xf32>
    %c0_5 = arith.constant 0 : index
    %c0_6 = arith.constant 0 : index
    %c0_7 = arith.constant 0 : index
    %5 = vector.load %arg1[%c0_5, %c0_6, %c0_7] : memref<1x8x16xf32, #tpu.memory_space<vmem>>, vector<1x8x16xf32>
    %6 = vector.shape_cast %5 : vector<1x8x16xf32> to vector<8x16xf32>
    %cst = arith.constant dense<0.000000e+00> : vector<8x256xf32>
    %7 = tpu.matmul %6, %0, %cst {dimension_numbers = #tpu.dot_dimension_numbers<[1], [0], [0], [1], [0, 0, 1, 1], [], []>} : vector<8x16xf32>, vector<16x256xf32>, vector<8x256xf32> -> vector<8x256xf32>
    %c0_8 = arith.constant 0 : index
    %c0_9 = arith.constant 0 : index
    %c0_10 = arith.constant 0 : index
    %8 = vector.load %arg2[%c0_8, %c0_9, %c0_10] : memref<1x8x1xf32, #tpu.memory_space<vmem>>, vector<1x8x1xf32>
    %9 = vector.shape_cast %8 : vector<1x8x1xf32> to vector<8x1xf32>
    %10 = vector.broadcast %9 : vector<8x1xf32> to vector<8x256xf32>
    %11 = vector.broadcast %3 : vector<1x256xf32> to vector<8x256xf32>
    %12 = arith.mulf %10, %11 : vector<8x256xf32>
    %13 = arith.addf %7, %12 : vector<8x256xf32>
    %14 = vector.broadcast %2 : vector<1x256xf32> to vector<8x256xf32>
    %15 = arith.addf %13, %14 : vector<8x256xf32>
    %cst_11 = arith.constant 0.000000e+00 : f32
    %16 = vector.broadcast %cst_11 : f32 to vector<8x256xf32>
    %17 = arith.maximumf %15, %16 : vector<8x256xf32>
    %cst_12 = arith.constant dense<0.000000e+00> : vector<8x256xf32>
    %18 = tpu.matmul %17, %1, %cst_12 {dimension_numbers = #tpu.dot_dimension_numbers<[1], [0], [0], [1], [0, 0, 1, 1], [], []>} : vector<8x256xf32>, vector<256x256xf32>, vector<8x256xf32> -> vector<8x256xf32>
    %19 = vector.broadcast %4 : vector<1x256xf32> to vector<8x256xf32>
    %20 = arith.addf %18, %19 : vector<8x256xf32>
    %21 = vector.extract_strided_slice %20 {offsets = [0, 0], sizes = [8, 128], strides = [1, 1]} : vector<8x256xf32> to vector<8x128xf32>
    %22 = vector.extract_strided_slice %20 {offsets = [0, 128], sizes = [8, 128], strides = [1, 1]} : vector<8x256xf32> to vector<8x128xf32>
    %cst_13 = arith.constant dense<0.000000e+00> : vector<8x8xf32>
    %23 = tpu.matmul %21, %22, %cst_13 {dimension_numbers = #tpu.dot_dimension_numbers<[1], [1], [0], [0], [0, 0, 1, 0], [], []>} : vector<8x128xf32>, vector<8x128xf32>, vector<8x8xf32> -> vector<8x8xf32>
    %24 = tpu.iota {dimensions = array<i32: 0>} : vector<8x8xi32>
    %25 = tpu.iota {dimensions = array<i32: 1>} : vector<8x8xi32>
    %26 = arith.cmpi eq, %24, %25 : vector<8x8xi32>
    %cst_14 = arith.constant 0.000000e+00 : f32
    %27 = vector.broadcast %cst_14 : f32 to vector<8x8xf32>
    %28 = arith.select %26, %23, %27 : vector<8x8xi1>, vector<8x8xf32>
    %29 = vector.shape_cast %28 : vector<8x8xf32> to vector<1x8x8xf32>
    %cst_15 = arith.constant dense<0.000000e+00> : vector<1xf32>
    %30 = vector.multi_reduction <add>, %29, %cst_15 [1, 2] : vector<1x8x8xf32> to vector<1xf32>
    %31 = vector.shape_cast %30 : vector<1xf32> to vector<1x1x1xf32>
    %32 = vector.extract %31[0, 0, 0] : f32 from vector<1x1x1xf32>
    %cst_16 = arith.constant 8.000000e+00 : f32
    %33 = arith.divf %32, %cst_16 : f32
    %cst_17 = arith.constant -5.000000e+00 : f32
    %cst_18 = arith.constant 5.000000e+00 : f32
    %34 = vector.broadcast %cst_17 : f32 to vector<8x8xf32>
    %35 = arith.maximumf %34, %23 : vector<8x8xf32>
    %36 = vector.broadcast %cst_18 : f32 to vector<8x8xf32>
    %37 = arith.minimumf %36, %35 : vector<8x8xf32>
    %cst_19 = arith.constant 5.000000e+00 : f32
    %38 = vector.broadcast %cst_19 : f32 to vector<8x8xf32>
    %39 = arith.subf %37, %38 : vector<8x8xf32>
    %40 = math.exp %39 : vector<8x8xf32>
    %cst_20 = arith.constant 0.000000e+00 : f32
    %41 = vector.broadcast %cst_20 : f32 to vector<8x8xf32>
    %42 = arith.select %26, %41, %40 : vector<8x8xi1>, vector<8x8xf32>
    %43 = vector.shape_cast %42 : vector<8x8xf32> to vector<1x8x8xf32>
    %cst_21 = arith.constant dense<0.000000e+00> : vector<1xf32>
    %44 = vector.multi_reduction <add>, %43, %cst_21 [1, 2] : vector<1x8x8xf32> to vector<1xf32>
    %45 = vector.shape_cast %44 : vector<1xf32> to vector<1x1x1xf32>
    %46 = vector.extract %45[0, 0, 0] : f32 from vector<1x1x1xf32>
    %47 = math.log %46 : f32
    %cst_22 = arith.constant 5.000000e+00 : f32
    %48 = arith.addf %cst_22, %47 : f32
    %cst_23 = arith.constant 5.600000e+01 : f32
    %49 = math.log %cst_23 : f32
    %50 = arith.subf %48, %49 : f32
    %51 = arith.subf %33, %50 : f32
    %52 = vector.broadcast %51 : f32 to vector<8x128xf32>
    %c0_24 = arith.constant 0 : index
    %c0_25 = arith.constant 0 : index
    %c0_26 = arith.constant 0 : index
    %53 = vector.load %arg4[%c0_24, %c0_25, %c0_26] : memref<1x8x128xf32, #tpu.memory_space<vmem>>, vector<1x8x128xf32>
    %54 = vector.shape_cast %53 : vector<1x8x128xf32> to vector<8x128xf32>
    %55 = vector.shape_cast %52 : vector<8x128xf32> to vector<1x8x128xf32>
    tpu.vector_store %arg4[%c0_24, %c0_25, %c0_26], %55 {strides = array<i32>} : memref<1x8x128xf32, #tpu.memory_space<vmem>>, vector<1x8x128xf32>,
    return
  }
  func.func @transform_0(%arg0: i32) -> (i32, i32, i32) {
    %c0_i32 = arith.constant 0 : i32
    %c0_i32_0 = arith.constant 0 : i32
    %c0_i32_1 = arith.constant 0 : i32
    return %arg0, %c0_i32, %c0_i32_0 : i32, i32, i32
  }
  func.func @transform_1(%arg0: i32) -> (i32, i32, i32) {
    %c0_i32 = arith.constant 0 : i32
    %c0_i32_0 = arith.constant 0 : i32
    %c0_i32_1 = arith.constant 0 : i32
    return %arg0, %c0_i32, %c0_i32_0 : i32, i32, i32
  }
  func.func @transform_2(%arg0: i32) -> (i32, i32) {
    %c0_i32 = arith.constant 0 : i32
    %c0_i32_0 = arith.constant 0 : i32
    %c0_i32_1 = arith.constant 0 : i32
    return %c0_i32, %c0_i32_0 : i32, i32
  }
  func.func @transform_3(%arg0: i32) -> (i32, i32, i32) {
    %c0_i32 = arith.constant 0 : i32
    %c0_i32_0 = arith.constant 0 : i32
    %c0_i32_1 = arith.constant 0 : i32
    return %arg0, %c0_i32, %c0_i32_0 : i32, i32, i32
  }
}

</mosaic_0001>

<bundles_post_ra>
// kernel: tpu_custom_call.1
= control target key start
LH: loop header
LB: loop body
LE: loop exit
PB: predicated region body
PF: predicated region fallthrough
CT: control target
= control target key end

     0   :  { %8 = vsyncpa [#allocation3], 0  ;;  %s1098_s0 = inlined_call_operand.vmem [shape: f32[4,8,16], index: 0, kind: input, shape index: {}]   ;;  %s1099_s1 = inlined_call_operand.vmem [shape: f32[4,8,1], index: 1, kind: input, shape index: {}]   ;;  %s1100_s2 = inlined_call_operand.hbm [shape: f32[280,256], index: 2, kind: input, shape index: {}]   ;;  %s1101_s3 = inlined_call_operand.hbm [shape: f32[4,8,128], index: 3, kind: output, shape index: {}]  }
   0x1   :  { %9 = vsyncpa [#allocation4], 0 }
   0x2   :  { %11 = vsyncpa [#allocation4 + $0x1], 0  ;;  %s957_s12 = smov 0   ;;  %s959_s13 = smov 0  }
   0x3   :  { %s961_s14 = smov 0   ;;  %s963_s15 = smov 0  }
   0x4 LB: > { %s978_s16 = sadd.s32 4294967295, %s928_s15   ;;  %s676_s17 = sadd.s32 4294967294, %s928_s15   ;;  %s928_s15 = sphi %s963_s15, %s1117_s15   ;;  %s924_s14 = sphi %s961_s14, %s1116_s14   ;;  %s920_s13 = sphi %s959_s13, %s1115_s13   ;;  %s916_s12 = sphi %s957_s12, %s1114_s12  }
   0x5   : > { %s982_s18 = sadd.s32 1, %s928_s15   ;;  %s97_s19 = sadd.s32 1, %s924_s14 }
   0x6   : > { %s94_s20 = ssub.s32 %s928_s15, %s982_s18  ;;  %p107_p0 = scmp.ne.s32.totalorder %s924_s14, %s920_s13 }
   0x7   : > { %p95_p1 = scmp.eq.s32.totalorder %s94_s20, 0  ;;  %p108_p2 = scmp.eq.s32.totalorder %s978_s16, 3 }
   0x8   : > { %p113_p3 = scmp.ne.s32.totalorder %s920_s13, %s916_s12  ;;  %p114_p4 = scmp.eq.s32.totalorder %s676_s17, 3 }
   0x9   : > { %s993_s21 = scalar_select %p95_p1, %s924_s14, %s97_s19  }
   0xa   : > { %p995_p5 = por %p108_p2, %p107_p0  ;;  %p999_p6 = por %p114_p4, %p113_p3 }
   0xb   : > { %p677_p7 = scmp.ge.s32.totalorder %s928_s15, 1  ;;  %p121_p8 = scmp.lt.s32.totalorder %s928_s15, 5 }
   0xc   : > { %s1105_s22 = scalar_select %p995_p5, 1, 0 }
   0xd   : > { %s1106_s23 = scalar_select %p999_p6, 1, 0 }
   0xe   : > { %p1102_p9 = scmp.eq.s32.totalorder %s978_s16, 0  ;;  %p1006_p10 = pnand %p677_p7, %p121_p8 }
   0xf   : > { %s930_s25 = smov [#allocation2]   ;;  %s834_s30 = scalar_lea.hbm %s1100_s2, 8960 }
  0x10   : > { %s1107_s24 = scalar_select %p1006_p10, 1, 0 }
  0x11   : > { %s133_s26 = sshll.u32 %s930_s25, 4  ;;  %p780_p11 = pneg %p1006_p10  ;;  %s134_s26 = int_to_ptr.vmem [resolvable:$true] %s133_s26 }
  0x12   : > { %p835_p13 = scmp.ne.s32.totalorder %s1100_s2, %s834_s30  ;;  %p841_p3 = scmp.lt.u32.totalorder %s834_s30, %s1100_s2 }
  0x13   : > { %p1014_p12 = pnand %p1102_p9, %p780_p11 }
  0x15   : > { %p836_p0 = pneg %p1014_p12 }
  0x17   : > { %p837_p1 = pnand %p836_p0, %p835_p13 }
  0x19   : > { %p838_p2 = pneg %p837_p1 }
  0x1b   : > { %p843_p4 = pnand %p841_p3, %p838_p2 }
  0x1d   : > { %846 = shalt.err (!%p843_p4)
}
  0x1e   : > { %s847_s8 = scalar_lea.vmem %s134_s26, 8960  ;;  %p855_p9 = scmp.lt.s32.totalorder %s134_s26, %s134_s26 }
  0x1f   : > { %p848_p7 = scmp.ne.s32.totalorder %s134_s26, %s847_s8  ;;  %p856_p6 = scmp.lt.s32.totalorder %s847_s8, %s847_s8 }
  0x21   : > { %p850_p8 = pnand %p848_p7, %p836_p0  ;;  %p857_p5 = por %p856_p6, %p855_p9 }
  0x23   : > { %p851_p11 = pneg %p850_p8 }
  0x25   : > { %p858_p10 = pnand %p857_p5, %p851_p11 }
  0x27   : > { %861 = shalt.err (!%p858_p10)
}
  0x28   : > { %s931_s9 = smov 256   ;;  %s932_s10 = smov 16  }
  0x29   : > { %783 = dma.hbm_to_vmem [thread:$0]  (!%p1014_p12), %s1100_s2, 8960, %s134_s26, [#allocation3], %s931_s9, %s931_s9, %s932_s10  }
  0x2a   : > { %p1109_p13 = scmp.ne.s32.totalorder %s1107_s24, 0 }
  0x2b   : > { %p1110_p1 = scmp.eq.s32.totalorder (!%p1109_p13), %s978_s16, 0 }
  0x2c   : > { %163 = sbr.rel (%p1109_p13) target bundleno = 1018 (0x3fa), region = 32 }
  0x33   : > { %907 = dma.done.wait (%p1110_p1), [#allocation3], 8960   ;;  %p1111_p0 = pmov %p1110_p1 }
  0x34   : > { %p190_p5 = scmp.lt.s32.totalorder %s978_s16, 3  ;;  %v933_v0 = vmov 0.0   ;;  %v934_v1 = vmov 0   ;;  %v199_v2 = vld [vmem:[#allocation2 + $0x8] sm:$0xff]  ;;  %v201_v3 = vld [vmem:[#allocation2 + $0x18] sm:$0xff]  ;;  %v198_v4 = vld [vmem:[#allocation2] sm:$0xff] }
  0x35   : > { %909 = vsyncadd (%p1111_p0), [#allocation3], 4294958336  ;;  %360 = vmatprep.mubr.f32.mxu0 %v933_v0  ;;  %829 = vset.pattern.permute.xlu0 %v934_v1  ;;  %v700_v5 = vpack.c.bf16 %v201_v3, %v199_v2  ;;  %v200_v6 = vld [vmem:[#allocation2 + $0x10] sm:$0xff]  ;;  %v203_v10 = vld [vmem:[#allocation2 + $0x28] sm:$0xff]  ;;  %vm292_vm0 = vcmask 130048   ;;  %vm935_vm1 = vmmov 0  }
  0x36   : > { %s191_s19 = scalar_select %p190_p5, %s978_s16, 3  ;;  %v702_v8 = vpack.c.bf16 %v200_v6, %v198_v4  ;;  %v205_v11 = vld [vmem:[#allocation2 + $0x38] sm:$0xff]  ;;  %v202_v12 = vld [vmem:[#allocation2 + $0x20] sm:$0xff]  ;;  %v204_v14 = vld [vmem:[#allocation2 + $0x30] sm:$0xff]  ;;  %vm540_vm3 = vcmask 64512  }
  0x37   : > { %701 = vmatprep.subr.bf16.mxu0 %v700_v5  ;;  %v704_v13 = vpack.c.bf16 %v205_v11, %v203_v10  ;;  %v207_v15 = vld [vmem:[#allocation2 + $0x48] sm:$0xff]  ;;  %v209_v16 = vld [vmem:[#allocation2 + $0x58] sm:$0xff]  ;;  %v706_v17 = vpack.c.bf16 %v204_v14, %v202_v12  ;;  %v206_v19 = vld [vmem:[#allocation2 + $0x40] sm:$0xff]  ;;  %s187_s5 = sand.u32 1, %s920_s13   ;;  %s690_s9 = sshll.u32 %s978_s16, 7 }
  0x38   : > { %s683_s20 = sshll.u32 %s191_s19, 3  ;;  %703 = vmatpush1.bf16.msra.mxu0 %v702_v8  ;;  %v708_v18 = vpack.c.bf16 %v209_v16, %v207_v15  ;;  %v208_v20 = vld [vmem:[#allocation2 + $0x50] sm:$0xff]  ;;  %v211_v21 = vld [vmem:[#allocation2 + $0x68] sm:$0xff]  ;;  %v213_v22 = vld [vmem:[#allocation2 + $0x78] sm:$0xff]  ;;  %s682_s6 = sshll.u32 %s187_s5, 3 }
  0x39   : > { %s197_s24 = scalar_lea.vmem %s1099_s1, %s683_s20  ;;  %s193_s29 = scalar_lea.vmem %s1098_s0, %s683_s20  ;;  %705 = vmatprep.subr.bf16.mxu1 %v704_v13  ;;  %695 = vmatprep.subr.mxu0 %v933_v0  ;;  %v710_v23 = vpack.c.bf16 %v208_v20, %v206_v19  ;;  %v712_v24 = vpack.c.bf16 %v213_v22, %v211_v21  ;;  %v210_v25 = vld [vmem:[#allocation2 + $0x60] sm:$0xff]  ;;  %v212_v26 = vld [vmem:[#allocation2 + $0x70] sm:$0xff]  ;;  %v215_v27 = vld [vmem:[#allocation2 + $0x88] sm:$0xff] }
  0x3a   : > { %v273_v7 = vld [vmem:[%s197_s24] sm:$0xff]  ;;  %707 = vmatpush1.bf16.msra.mxu1 %v706_v17  ;;  %v217_v28 = vld [vmem:[#allocation2 + $0x98] sm:$0xff]  ;;  %v714_v29 = vpack.c.bf16 %v212_v26, %v210_v25  ;;  %v216_v32 = vld [vmem:[#allocation2 + $0x90] sm:$0xff]  ;;  %s189_s10 = scalar_lea.vmem [#allocation5], %s682_s6  ;;  %s1056_s24 = scalar_lea.hbm %s1101_s3, %s690_s9 }
  0x3b   : > { %v272_v9 = vld [vmem:[%s193_s29] sm:$0xff]  ;;  %276 = vperm.xlu0 %829, %v273_v7   ;;  %709 = vmatprep.subr.bf16.mxu1 %v708_v18  ;;  %v716_v30 = vpack.c.bf16 %v217_v28, %v215_v27  ;;  %v219_v33 = vld [vmem:[#allocation2 + $0xa8] sm:$0xff]  ;;  %v221_v34 = vld [vmem:[#allocation2 + $0xb8] sm:$0xff]  ;;  %s593_s11 = sshll.u32 %s189_s10, 4  ;;  %s580_s27 = scalar_lea.sflag [#allocation4], %s187_s5  ;;  %s1058_s11 = int_to_ptr.vmem [resolvable:$true] %s593_s11 }
  0x3c   : > { %685 = vmatmul.mubr.msk.f32.vlgmr.msra.gmra.mrb[0].mxu0 %vm292_vm0, %v272_v9  ;;  %v214_v31 = vld [vmem:[#allocation2 + $0x80] sm:$0xff]  ;;  %v720_v36 = vpack.c.bf16 %v221_v34, %v219_v33  ;;  %v220_v38 = vld [vmem:[#allocation2 + $0xb0] sm:$0xff]  ;;  %v223_v39 = vld [vmem:[#allocation2 + $0xc8] sm:$0xff]  ;;  %s862_s28 = scalar_lea.vmem %s1058_s11, 128  ;;  %p1112_p9 = scmp.ne.s32.totalorder %s1105_s22, 0 }
  0x3d   : > { %v718_v35 = vpack.c.bf16 %v216_v32, %v214_v31  ;;  %v218_v37 = vld [vmem:[#allocation2 + $0xa0] sm:$0xff]  ;;  %v225_v40 = vld [vmem:[#allocation2 + $0xd8] sm:$0xff]  ;;  %v224_v44 = vld [vmem:[#allocation2 + $0xd0] sm:$0xff]  ;;  %697 = vmatprep.mubr.msk.f32.mxu0 %vm935_vm1, %v933_v0  ;;  %p863_p6 = scmp.ne.s32.totalorder %s1058_s11, %s862_s28  ;;  %s936_s16 = smov [#allocation5]  }
  0x3e   : > { %711 = vmatpush1.bf16.msra.mxu1 %v710_v23  ;;  %v722_v41 = vpack.c.bf16 %v220_v38, %v218_v37  ;;  %v724_v42 = vpack.c.bf16 %v225_v40, %v223_v39  ;;  %v222_v43 = vld [vmem:[#allocation2 + $0xc0] sm:$0xff]  ;;  %v227_v45 = vld [vmem:[#allocation2 + $0xe8] sm:$0xff]  ;;  %v229_v46 = vld [vmem:[#allocation2 + $0xf8] sm:$0xff]  ;;  %s866_s29 = sshll.u32 %s936_s16, 4  ;;  %s867_s29 = int_to_ptr.vmem [resolvable:$false] %s866_s29 }
  0x3f   : > { %713 = vmatprep.subr.bf16.mxu1 %v712_v24  ;;  %v726_v47 = vpack.c.bf16 %v224_v44, %v222_v43  ;;  %v728_v48 = vpack.c.bf16 %v229_v46, %v227_v45  ;;  %v226_v49 = vld [vmem:[#allocation2 + $0xe0] sm:$0xff]  ;;  %v228_v50 = vld [vmem:[#allocation2 + $0xf0] sm:$0xff]  ;;  %v231_v51 = vld [vmem:[#allocation2 + $0x108] sm:$0xff]  ;;  %v280_v43 = vlaneseq  ;;  %p864_p10 = pnand %p863_p6, %p1112_p9  ;;  %p869_p2 = scmp.lt.s32.totalorder %s1058_s11, %s867_s29 }
  0x40   : > { %v233_v52 = vld [vmem:[#allocation2 + $0x118] sm:$0xff]  ;;  %v730_v53 = vpack.c.bf16 %v228_v50, %v226_v49  ;;  %v230_v55 = vld [vmem:[#allocation2 + $0x100] sm:$0xff]  ;;  %v232_v56 = vld [vmem:[#allocation2 + $0x110] sm:$0xff] }
  0x41   : > { %v732_v54 = vpack.c.bf16 %v233_v52, %v231_v51  ;;  %v235_v57 = vld [vmem:[#allocation2 + $0x128] sm:$0xff]  ;;  %v237_v58 = vld [vmem:[#allocation2 + $0x138] sm:$0xff]  ;;  %v734_v59 = vpack.c.bf16 %v232_v56, %v230_v55  ;;  %v234_v61 = vld [vmem:[#allocation2 + $0x120] sm:$0xff]  ;;  %v281_v44 = vshrl.u32 %v280_v43, 7  ;;  %p865_p12 = pneg %p864_p10 }
  0x42   : > { %715 = vmatpush1.bf16.msra.mxu1 %v714_v29  ;;  %v736_v60 = vpack.c.bf16 %v237_v58, %v235_v57  ;;  %v236_v62 = vld [vmem:[#allocation2 + $0x130] sm:$0xff]  ;;  %v239_v63 = vld [vmem:[#allocation2 + $0x148] sm:$0xff]  ;;  %v241_v1 = vld [vmem:[#allocation2 + $0x158] sm:$0xff] }
  0x43   : > { %717 = vmatprep.subr.bf16.mxu1 %v716_v30  ;;  %v738_v2 = vpack.c.bf16 %v236_v62, %v234_v61  ;;  %v740_v3 = vpack.c.bf16 %v241_v1, %v239_v63  ;;  %v238_v4 = vld [vmem:[#allocation2 + $0x140] sm:$0xff]  ;;  %v240_v5 = vld [vmem:[#allocation2 + $0x150] sm:$0xff]  ;;  %v243_v6 = vld [vmem:[#allocation2 + $0x168] sm:$0xff]  ;;  %v282_v45 = vsub.s32 0, %v281_v44  ;;  %v286_v46 = vsub.s32 1, %v281_v44 }
  0x44   : > { %v245_v7 = vld [vmem:[#allocation2 + $0x178] sm:$0xff]  ;;  %v742_v8 = vpack.c.bf16 %v240_v5, %v238_v4  ;;  %v242_v10 = vld [vmem:[#allocation2 + $0x160] sm:$0xff]  ;;  %v244_v11 = vld [vmem:[#allocation2 + $0x170] sm:$0xff] }
  0x45   : > { %v744_v9 = vpack.c.bf16 %v245_v7, %v243_v6  ;;  %v247_v12 = vld [vmem:[#allocation2 + $0x188] sm:$0xff]  ;;  %v249_v13 = vld [vmem:[#allocation2 + $0x198] sm:$0xff]  ;;  %v746_v14 = vpack.c.bf16 %v244_v11, %v242_v10  ;;  %v246_v16 = vld [vmem:[#allocation2 + $0x180] sm:$0xff] }
  0x46   : > { %719 = vmatpush1.bf16.msra.mxu1 %v718_v35  ;;  %v748_v15 = vpack.c.bf16 %v249_v13, %v247_v12  ;;  %v248_v17 = vld [vmem:[#allocation2 + $0x190] sm:$0xff]  ;;  %v251_v18 = vld [vmem:[#allocation2 + $0x1a8] sm:$0xff]  ;;  %v253_v19 = vld [vmem:[#allocation2 + $0x1b8] sm:$0xff] }
  0x47   : > { %721 = vmatprep.subr.bf16.mxu1 %v720_v36  ;;  %v750_v20 = vpack.c.bf16 %v248_v17, %v246_v16  ;;  %v752_v21 = vpack.c.bf16 %v253_v19, %v251_v18  ;;  %v250_v22 = vld [vmem:[#allocation2 + $0x1a0] sm:$0xff]  ;;  %v252_v23 = vld [vmem:[#allocation2 + $0x1b0] sm:$0xff]  ;;  %v255_v24 = vld [vmem:[#allocation2 + $0x1c8] sm:$0xff] }
  0x48   : > { %v257_v25 = vld [vmem:[#allocation2 + $0x1d8] sm:$0xff]  ;;  %v754_v26 = vpack.c.bf16 %v252_v23, %v250_v22  ;;  %v254_v28 = vld [vmem:[#allocation2 + $0x1c0] sm:$0xff]  ;;  %v256_v29 = vld [vmem:[#allocation2 + $0x1d0] sm:$0xff] }
  0x49   : > { %v756_v27 = vpack.c.bf16 %v257_v25, %v255_v24  ;;  %v758_v30 = vpack.c.bf16 %v256_v29, %v254_v28  ;;  %v259_v31 = vld [vmem:[#allocation2 + $0x1e8] sm:$0xff]  ;;  %v261_v32 = vld [vmem:[#allocation2 + $0x1f8] sm:$0xff]  ;;  %v258_v34 = vld [vmem:[#allocation2 + $0x1e0] sm:$0xff] }
  0x4a   : > { %723 = vmatpush1.bf16.msra.mxu1 %v722_v41  ;;  %v760_v33 = vpack.c.bf16 %v261_v32, %v259_v31  ;;  %v260_v35 = vld [vmem:[#allocation2 + $0x1f0] sm:$0xff]  ;;  %v263_v37 = vld [vmem:[#allocation2 + $0x208] sm:$0xff]  ;;  %v265_v38 = vld [vmem:[#allocation2 + $0x218] sm:$0xff] }
  0x4b   : > { %725 = vmatprep.subr.bf16.mxu1 %v724_v42  ;;  %v762_v36 = vpack.c.bf16 %v260_v35, %v258_v34  ;;  %v764_v39 = vpack.c.bf16 %v265_v38, %v263_v37  ;;  %v262_v40 = vld [vmem:[#allocation2 + $0x200] sm:$0xff]  ;;  %v264_v41 = vld [vmem:[#allocation2 + $0x210] sm:$0xff] }
  0x4c   : > { %v766_v42 = vpack.c.bf16 %v264_v41, %v262_v40  ;;  %v267_v51 = vld [vmem:[#allocation2 + $0x220] ss:$8 sm:$0x3]  ;;  %v271_v1 = vld [vmem:[#allocation2 + $0x222] ss:$8 sm:$0x3] }
  0x4d   : > { %v375_v56 = vrot.slane %v267_v51, %v286_v46  ;;  %v386_v4 = vrot.slane %v271_v1, %v282_v45 }
  0x4e   : > { %727 = vmatpush1.bf16.msra.mxu1 %v726_v47  ;;  %v269_v47 = vld [vmem:[#allocation2 + $0x221] ss:$8 sm:$0x3] }
  0x4f   : > { %729 = vmatprep.subr.bf16.mxu1 %v728_v48  ;;  %v283_v48 = vrot.slane %v269_v47, %v282_v45  ;;  %v287_v50 = vrot.slane %v269_v47, %v286_v46 }
  0x52   : > { %731 = vmatpush1.bf16.msra.mxu1 %v730_v53 }
  0x53   : > { %733 = vmatprep.subr.bf16.mxu1 %v732_v54  ;;  %v371_v54 = vrot.slane %v267_v51, %v282_v45 }
  0x56   : > { %735 = vmatpush1.bf16.msra.mxu1 %v734_v59 }
  0x57   : > { %737 = vmatprep.subr.bf16.mxu1 %v736_v60 }
  0x5a   : > { %739 = vmatpush1.bf16.msra.mxu1 %v738_v2  ;;  %v390_v2 = vrot.slane %v271_v1, %v286_v46 }
  0x5b   : > { %741 = vmatprep.subr.bf16.mxu1 %v740_v3 }
  0x5e   : > { %743 = vmatpush1.bf16.msra.mxu1 %v742_v8  ;;  %v537_v8 = vand.u32 127, %v280_v43 }
  0x5f   : > { %745 = vmatprep.subr.bf16.mxu1 %v744_v9 }
  0x60   : > { %vm538_vm2 = vcmp.eq.s32.totalorder %v281_v44, %v537_v8 }
  0x62   : > { %747 = vmatpush1.bf16.msra.mxu1 %v746_v14 }
  0x63   : > { %749 = vmatprep.subr.bf16.mxu1 %v748_v15 }
  0x66   : > { %751 = vmatpush1.bf16.msra.mxu1 %v750_v20 }
  0x67   : > { %753 = vmatprep.subr.bf16.mxu1 %v752_v21 }
  0x6a   : > { %755 = vmatpush1.bf16.msra.mxu1 %v754_v26 }
  0x6b   : > { %757 = vmatprep.subr.bf16.mxu1 %v756_v27 }
  0x6e   : > { %759 = vmatpush1.bf16.msra.mxu1 %v758_v30 }
  0x6f   : > { %761 = vmatprep.subr.bf16.mxu1 %v760_v33 }
  0x72   : > { %763 = vmatpush1.bf16.msra.mxu1 %v762_v36 }
  0x73   : > { %765 = vmatprep.subr.bf16.mxu1 %v764_v39 }
  0x76   : > { %767 = vmatpush1.bf16.msra.mxu1 %v766_v42 }
  0xba   : > { %v277_v49 = vpop.permute.xlu0 %276 }
  0xbb   : > { %v290_v52 = vmul.f32 %v283_v48, %v277_v49  ;;  %v291_v53 = vmul.f32 %v287_v50, %v277_v49 }
 0x10f   : > { %v362_v55 = vpop.f32.mrb[0].mxu0 }
 0x110   : > { %v363_v57 = vadd.f32 %v362_v55, %v290_v52  ;;  %v364_v58 = vpop.f32.mrb[1].mxu0 }
 0x111   : > { %v365_v59 = vadd.f32 %v364_v58, %v291_v53 }
 0x112   : > { %v378_v60 = vadd.f32 %v371_v54, %v363_v57 }
 0x113   : > { %v379_v61 = vadd.f32 %v375_v56, %v365_v59 }
 0x114   : > { %v380_v63 = vmax.f32 %v378_v60, 0.0 }
 0x115   : > { %v381_v62 = vmax.f32 %v379_v61, 0.0 }
 0x117   : > { %457 = vmatprep.mubr.f32.mxu1 %v381_v62 }
 0x118   : > { %458 = vmatmul.mubr.f32.vlgmr.msra.gmra.mrb[0].mxu1 %v380_v63 }
 0x1eb   : > { %v459_v3 = vpop.f32.mrb[0].mxu1 }
 0x1ec   : > { %v461_v5 = vpop.f32.mrb[1].mxu1  ;;  %v460_v7 = vadd.f32 %v459_v3, %v386_v4 }
 0x1ed   : > { %v462_v6 = vadd.f32 %v461_v5, %v390_v2 }
 0x1ef   : > { %696 = vmatpush3.xpose.msra.mxu0 %v462_v6 }
 0x1f2   : > { %698 = vmatmul.mubr.f32.vlgmr.msra.gmra.mrb[2].mxu0 %v460_v7 }
 0x2c5   : > { %v530_v9 = vpop.f32.mrb[2].mxu0 }
 0x2c6   : > { %v686_v10 = vclamps-f32 %v530_v9, 5.0  ;;  %v699_v11 = vpop.f32.mrb[3].mxu0  ;;  %v539_v12 = vsel %vm538_vm2, %v530_v9, 0.0 }
 0x2c7   : > { %v541_v13 = vsel %vm540_vm3, %v539_v12, 0.0 }
 0x2c8   : > { %v687_v14 = vadd.f32 -5.0, %v686_v10  ;;  %542 = vadd.xlane.f32.xlu0 %v541_v13 }
 0x2ca   : > { %v557_v0 = vmul.f32 1.442695, %v687_v14 }
 0x2cc   : > { %830 = vpow2.f32 %v557_v0 }
 0x2d6   : > { %v831_v15 = vpop.eup %830 }
 0x2d7   : > { %v559_v16 = vsel %vm538_vm2, 0.0, %v831_v15 }
 0x2d8   : > { %v560_v17 = vsel %vm540_vm3, %v559_v16, 0.0 }
 0x2d9   : > { %561 = vadd.xlane.f32.xlu1 %v560_v17 }
 0x355   : > { %v543_v18 = vpop.xlane.xlu0 %542 }
 0x356   : > { %v544_v19 = vrot.slane %v543_v18, 4 }
 0x358   : > { %v545_v20 = vadd.f32 %v544_v19, %v543_v18 }
 0x35a   : > { %v546_v21 = vrot.slane %v545_v20, 2 }
 0x35c   : > { %v547_v22 = vadd.f32 %v546_v21, %v545_v20 }
 0x35e   : > { %v548_v23 = vrot.slane %v547_v22, 1 }
 0x360   : > { %v549_v24 = vadd.f32 %v548_v23, %v547_v22 }
 0x362   : > { %768 = vpush %v549_v24 }
 0x366   : > { %v562_v25 = vpop.xlane.xlu1 %561 }
 0x367   : > { %v563_v26 = vrot.slane %v562_v25, 4 }
 0x369   : > { %v564_v27 = vadd.f32 %v563_v26, %v562_v25 }
 0x36b   : > { %v565_v28 = vrot.slane %v564_v27, 2 }
 0x36d   : > { %v566_v29 = vadd.f32 %v565_v28, %v564_v27 }
 0x36f   : > { %v567_v30 = vrot.slane %v566_v29, 1 }
 0x371   : > { %v568_v31 = vadd.f32 %v567_v30, %v566_v29 }
 0x373   : > { %770 = vpush %v568_v31 }
 0x393   : > { %s769_s30 = spop %768 }
 0x394   : > { %s553_s17 = smul.f32 0.125, %s769_s30  ;;  %s868_s30 = scalar_lea.vmem %s867_s29, 256 }
 0x395   : > { %p870_p3 = scmp.lt.s32.totalorder %s868_s30, %s862_s28 }
 0x397   : > { %p871_p4 = por %p870_p3, %p869_p2 }
 0x399   : > { %p872_p7 = pnand %p871_p4, %p865_p12 }
 0x3a4   : > { %s771_s4 = spop %770 }
 0x3a5   : > { %v570_v32 = vstv %s771_s4 }
 0x3a6   : > { %832 = vlog2.f32 %v570_v32 }
 0x3b0   : > { %v833_v33 = vpop.eup %832 }
 0x3b1   : > { %v572_v34 = vmul.f32 0.6931472, %v833_v33 }
 0x3b3   : > { %772 = vpush %v572_v34 }
 0x3e4   : > { %s773_s7 = spop %772 }
 0x3e5   : > { %s574_s8 = sadd.f32 5.0, %s773_s7 }
 0x3e7   : > { %s688_s19 = sadd.f32 -4.0253515, %s574_s8 }
 0x3e9   : > { %s576_s20 = ssub.f32 %s553_s17, %s688_s19 }
 0x3eb   : > { %v577_v35 = vstv %s576_s20 }
 0x3ec   : > { %578 = vst [vmem:[%s189_s10] sm:$0xff] %v577_v35 }
 0x3ed   : > { %875 = shalt.err (!%p872_p7)
}
 0x3ee   : > { %s876_s4 = scalar_lea.hbm %s1056_s24, 128  ;;  %s880_s7 = scalar_lea.hbm %s1101_s3, 512 }
 0x3ef   : > { %p877_p8 = scmp.ne.s32.totalorder %s1056_s24, %s876_s4  ;;  %p881_p1 = scmp.lt.u32.totalorder %s1056_s24, %s1101_s3 }
 0x3f0   : > { %p882_p0 = scmp.lt.u32.totalorder %s880_s7, %s876_s4  ;;  %p884_p6 = scmp.lt.u32.totalorder %s876_s4, %s1056_s24 }
 0x3f1   : > { %p878_p11 = pnand %p877_p8, %p1112_p9 }
 0x3f2   : > { %p883_p5 = por %p882_p0, %p881_p1 }
 0x3f3   : > { %p879_p13 = pneg %p878_p11 }
 0x3f4   : > { %p885_p10 = por %p884_p6, %p883_p5 }
 0x3f6   : > { %p886_p12 = pnand %p885_p10, %p879_p13 }
 0x3f8   : > { %889 = shalt.err (!%p886_p12)
}
 0x3f9   : > { %778 = dma.vmem_to_hbm [thread:$0]  (%p1112_p9), %s1058_s11, 128, %s1056_s24, %s580_s27  }
 0x3fa PF: > { %p790_p2 = scmp.ge.s32.totalorder %s928_s15, 2  ;;  %s605_s10 = sand.u32 1, %s916_s12  }
 0x3fb   : > { %p1113_p3 = scmp.ne.s32.totalorder %s1106_s23, 0  ;;  %s606_s17 = scalar_lea.sflag [#allocation4], %s605_s10 }
 0x3fd   : > { %p785_p4 = pnand %p790_p2, %p1113_p3 }
 0x3ff   : > { %911 = dma.done.wait (!%p785_p4), %s606_s17, 128  }
 0x400   : > { %913 = vsyncadd (!%p785_p4), %s606_s17, 4294967168  ;;  %p14_p7 = scmp.ge.s32.totalorder %s982_s18, 6   ;;  %s1114_s12 = smov %s920_s13 }
 0x401   : > { %s1115_s13 = smov %s924_s14  ;;  %s1116_s14 = smov %s993_s21 }
 0x402   : > { %s1117_s15 = smov %s982_s18  ;;  %16 = sbr.rel (!%p14_p7) target bundleno = 4 (0x4), region = 78 }
 0x409   :  { %611 = vsyncpa [#allocation3], 1 }
 0x40a   :  { %613 = vsyncpa [#allocation3 + $0x1], 1 }
 0x40b   :  { %614 = vsyncpa [#allocation4], 1 }
 0x40c   :  { %616 = vsyncpa [#allocation4 + $0x1], 1 }

</bundles_post_ra>
